<compile_context>
chip_gen: v7x
topology: tpu7x:2x2x1
jax: 0.10.0
libtpu: 0.0.40
codegen_flags: <defaults>
</compile_context>

<pallas_src>
import functools
import math

import numpy as np
import jax
import jax.numpy as jnp
from jax.experimental import pallas as pl
from jax.experimental.pallas import tpu as pltpu

LANE = 128      # vreg lane width (last dim)
SUBLANE = 8     # vreg sublane count (second-to-last dim)


def _round_up(x, m):
    return (x + m - 1) // m * m


def _cdiv(a, b):
    return (a + b - 1) // b


def _pick_tile_m(m, tile_m):
    """Row-tile size: multiple of 8, <= tile_m, and >= 4 tiles when M is large."""
    tm = tile_m
    if m > 4 * SUBLANE:
        # At least 4 row tiles -> 2 per TensorCore on dual-TC chips, and the
        # pipeline has something to double-buffer.
        tm = min(tm, _round_up(_cdiv(m, 4), SUBLANE))
    tm = max(SUBLANE, min(tm, _round_up(m, SUBLANE)))
    return tm


def _ff_chunks(d_ff, chunk):
    """Static (lo, hi) boundaries over the d_ff axis (128-aligned chunk starts)."""
    if chunk is None or chunk >= d_ff or chunk % LANE != 0:
        return ((0, d_ff),)
    bounds = []
    lo = 0
    while lo < d_ff:
        hi = min(lo + chunk, d_ff)
        bounds.append((lo, hi))
        lo = hi
    return tuple(bounds)


# ----------------------------- fused FFN kernel -----------------------------
def _ffn_kernel(x_ref, w1_ref, b1_ref, w2_ref, b2_ref, o_ref, *, ff_chunks):
    # One M-tile of: y = relu(x @ W1 + b1) @ W2 + b2
    # x tile arrives as bf16; weights are resident bf16; accumulation is f32.
    # d_ff is consumed chunk-by-chunk so the (tm, d_ff) intermediate never
    # materializes -- only a (tm, chunk) slab plus the (tm, d_model) accumulator.
    x = x_ref[...]                                        # (tm, d_model) bf16
    acc = jnp.zeros(o_ref.shape, jnp.float32)             # (tm, d_model) f32
    for lo, hi in ff_chunks:                              # static slices: zero-cost views
        h = jnp.dot(x, w1_ref[:, lo:hi], preferred_element_type=jnp.float32)
        h = jnp.maximum(h + b1_ref[:, lo:hi], 0.0)        # f32 bias + ReLU epilogue
        acc = acc + jnp.dot(h.astype(jnp.bfloat16), w2_ref[lo:hi, :],
                            preferred_element_type=jnp.float32)
    o_ref[...] = (acc + b2_ref[...]).astype(o_ref.dtype)


# ----------------------------- wrapper -----------------------------
def positionwise_feed_forward(x, w1, b1, w2, b2, *, tile_m=512, ff_chunk=512):
    """y = relu(x @ w1 + b1) @ w2 + b2   (dropout = eval-mode identity).

    w1: (d_model, d_ff), w2: (d_ff, d_model) -- nn.Linear weights pre-transposed to
    (in_features, out_features). x: (..., d_model). Output dtype == x.dtype.
    For a zero-copy hot path, pre-cast w1/w2 to bf16 (e.g. at weight-load time).
    """
    orig_shape = x.shape
    out_dtype = x.dtype
    d_model = orig_shape[-1]
    d_ff = w1.shape[1]
    m = int(np.prod(orig_shape[:-1])) if len(orig_shape) > 1 else 1

    bf16 = jnp.bfloat16
    f32 = jnp.float32

    # bf16 activations / weights into the MXU; f32 biases for the f32 epilogue.
    # These are pure casts / reshapes -- no zero-pad copies on the hot path.
    x2 = x.reshape(m, d_model)
    if x2.dtype != bf16:
        x2 = x2.astype(bf16)
    w1b = w1 if w1.dtype == bf16 else w1.astype(bf16)
    w2b = w2 if w2.dtype == bf16 else w2.astype(bf16)
    b1f = b1.reshape(1, d_ff).astype(f32)
    b2f = b2.reshape(1, d_model).astype(f32)

    tm = _pick_tile_m(m, tile_m)
    grid = (_cdiv(m, tm),)
    chunks = _ff_chunks(d_ff, ff_chunk)
    max_chunk = max(hi - lo for lo, hi in chunks)

    # VMEM budget estimate: resident weights/biases + double-buffered x/out tiles
    # + chunked intermediates, with 2x headroom, clamped to a safe scoped range.
    itemsize_out = jnp.dtype(out_dtype).itemsize
    est = ((w1b.size + w2b.size) * 2 + (b1f.size + b2f.size) * 4
           + 2 * tm * d_model * 2 + 2 * tm * d_model * itemsize_out
           + 3 * tm * max_chunk * 4)
    vmem_limit = int(min(max(2 * est, 32 * 1024 * 1024), 100 * 1024 * 1024))

    kernel = functools.partial(_ffn_kernel, ff_chunks=chunks)
    resident = pl.BlockSpec(memory_space=pltpu.MemorySpace.VMEM)  # single-buffered, whole array

    out = pl.pallas_call(
        kernel,
        grid=grid,
        out_shape=jax.ShapeDtypeStruct((m, d_model), out_dtype),
        in_specs=[
            pl.BlockSpec((tm, d_model), lambda i: (i, 0)),  # x tile (pipelined over M)
            resident,                                       # W1 (bf16, resident)
            resident,                                       # b1 (f32, resident)
            resident,                                       # W2 (bf16, resident)
            resident,                                       # b2 (f32, resident)
        ],
        out_specs=pl.BlockSpec((tm, d_model), lambda i: (i, 0)),
        compiler_params=pltpu.CompilerParams(
            # Independent row tiles: shard M across TensorCores on dual-TC chips.
            dimension_semantics=("parallel",),
            vmem_limit_bytes=vmem_limit,
        ),
    )(x2, w1b, b1f, w2b, b2f)

    return out.reshape(orig_shape)


# ----------------------------- main -----------------------------
if __name__ == "__main__":
    # Small shapes consistent with the module: (batch, seq, d_model) activations.
    B, T, D_MODEL, D_FF = 2, 8, 32, 64

    key = jax.random.PRNGKey(0)
    kx, k1, kb1, k2, kb2 = jax.random.split(key, 5)

    x = jax.random.normal(kx, (B, T, D_MODEL), jnp.float32)
    # nn.Linear(d_model, d_ff) weights, stored as (in, out).
    w1 = jax.random.normal(k1, (D_MODEL, D_FF), jnp.float32) * (1.0 / math.sqrt(D_MODEL))
    b1 = jax.random.normal(kb1, (D_FF,), jnp.float32) * 0.02
    w2 = jax.random.normal(k2, (D_FF, D_MODEL), jnp.float32) * (1.0 / math.sqrt(D_FF))
    b2 = jax.random.normal(kb2, (D_MODEL,), jnp.float32) * 0.02

    out = positionwise_feed_forward(x, w1, b1, w2, b2)
    out = jax.block_until_ready(out)

    # Pure-JAX f32 reference (dropout is an eval-mode no-op).
    ref = jnp.maximum(x @ w1 + b1, 0.0) @ w2 + b2

    assert out.shape == (B, T, D_MODEL)
    assert out.dtype == x.dtype
    assert bool(jnp.all(jnp.isfinite(out)))
    # bf16 MXU inputs with f32 accumulation: allow loose tolerance.
    np.testing.assert_allclose(np.asarray(out), np.asarray(ref), rtol=5e-2, atol=5e-2)

    print("KERNEL_OK")
</pallas_src>

<mosaic_0001>
module attributes {stable_mosaic.version = 11 : i64} {
  func.func @_ffn_kernel(%arg0: i32, %arg1: memref<16x32xbf16, #tpu.memory_space<vmem>>, %arg2: memref<32x64xbf16, #tpu.memory_space<vmem>>, %arg3: memref<1x64xf32, #tpu.memory_space<vmem>>, %arg4: memref<64x32xbf16, #tpu.memory_space<vmem>>, %arg5: memref<1x32xf32, #tpu.memory_space<vmem>>, %arg6: memref<16x32xf32, #tpu.memory_space<vmem>>) attributes {dimension_semantics = [#tpu.dimension_semantics<parallel>], iteration_bounds = array<i64: 1>, scalar_prefetch = 0 : i64, scratch_operands = 0 : i64, tpu.core_type = #tpu.core_type<tc>, window_params = [{transform_indices = @transform_0, window_bounds = array<i64: 16, 32>}, {pipeline_mode = #tpu.pipeline_mode<synchronous>, transform_indices = @transform_1, window_bounds = array<i64: 32, 64>}, {pipeline_mode = #tpu.pipeline_mode<synchronous>, transform_indices = @transform_2, window_bounds = array<i64: 1, 64>}, {pipeline_mode = #tpu.pipeline_mode<synchronous>, transform_indices = @transform_3, window_bounds = array<i64: 64, 32>}, {pipeline_mode = #tpu.pipeline_mode<synchronous>, transform_indices = @transform_4, window_bounds = array<i64: 1, 32>}, {transform_indices = @transform_5, window_bounds = array<i64: 16, 32>}]} {
    %c0 = arith.constant 0 : index
    %c0_0 = arith.constant 0 : index
    %0 = vector.load %arg1[%c0, %c0_0] : memref<16x32xbf16, #tpu.memory_space<vmem>>, vector<16x32xbf16>
    %cst = arith.constant 0.000000e+00 : f32
    %1 = vector.broadcast %cst : f32 to vector<16x32xf32>
    %c0_1 = arith.constant 0 : index
    %c0_2 = arith.constant 0 : index
    %2 = vector.load %arg2[%c0_1, %c0_2] : memref<32x64xbf16, #tpu.memory_space<vmem>>, vector<32x64xbf16>
    %cst_3 = arith.constant dense<0.000000e+00> : vector<16x64xf32>
    %3 = tpu.matmul %0, %2, %cst_3 {dimension_numbers = #tpu.dot_dimension_numbers<[1], [0], [0], [1], [0, 0, 1, 1], [], []>} : vector<16x32xbf16>, vector<32x64xbf16>, vector<16x64xf32> -> vector<16x64xf32>
    %c0_4 = arith.constant 0 : index
    %c0_5 = arith.constant 0 : index
    %4 = vector.load %arg3[%c0_4, %c0_5] : memref<1x64xf32, #tpu.memory_space<vmem>>, vector<1x64xf32>
    %5 = vector.broadcast %4 : vector<1x64xf32> to vector<16x64xf32>
    %6 = arith.addf %3, %5 : vector<16x64xf32>
    %cst_6 = arith.constant 0.000000e+00 : f32
    %7 = vector.broadcast %cst_6 : f32 to vector<16x64xf32>
    %8 = arith.maximumf %6, %7 : vector<16x64xf32>
    %9 = arith.truncf %8 : vector<16x64xf32> to vector<16x64xbf16>
    %c0_7 = arith.constant 0 : index
    %c0_8 = arith.constant 0 : index
    %10 = vector.load %arg4[%c0_7, %c0_8] : memref<64x32xbf16, #tpu.memory_space<vmem>>, vector<64x32xbf16>
    %cst_9 = arith.constant dense<0.000000e+00> : vector<16x32xf32>
    %11 = tpu.matmul %9, %10, %cst_9 {dimension_numbers = #tpu.dot_dimension_numbers<[1], [0], [0], [1], [0, 0, 1, 1], [], []>} : vector<16x64xbf16>, vector<64x32xbf16>, vector<16x32xf32> -> vector<16x32xf32>
    %12 = arith.addf %1, %11 : vector<16x32xf32>
    %c0_10 = arith.constant 0 : index
    %c0_11 = arith.constant 0 : index
    %13 = vector.load %arg5[%c0_10, %c0_11] : memref<1x32xf32, #tpu.memory_space<vmem>>, vector<1x32xf32>
    %14 = vector.broadcast %13 : vector<1x32xf32> to vector<16x32xf32>
    %15 = arith.addf %12, %14 : vector<16x32xf32>
    %c0_12 = arith.constant 0 : index
    %c0_13 = arith.constant 0 : index
    %16 = vector.load %arg6[%c0_12, %c0_13] : memref<16x32xf32, #tpu.memory_space<vmem>>, vector<16x32xf32>
    tpu.vector_store %arg6[%c0_12, %c0_13], %15 {strides = array<i32>} : memref<16x32xf32, #tpu.memory_space<vmem>>, vector<16x32xf32>,
    return
  }
  func.func @transform_0(%arg0: i32) -> (i32, i32) {
    %c0_i32 = arith.constant 0 : i32
    %c0_i32_0 = arith.constant 0 : i32
    return %arg0, %c0_i32 : i32, i32
  }
  func.func @transform_1(%arg0: i32) -> (i32, i32) {
    %c0_i32 = arith.constant 0 : i32
    %c0_i32_0 = arith.constant 0 : i32
    %c0_i32_1 = arith.constant 0 : i32
    return %c0_i32, %c0_i32_0 : i32, i32
  }
  func.func @transform_2(%arg0: i32) -> (i32, i32) {
    %c0_i32 = arith.constant 0 : i32
    %c0_i32_0 = arith.constant 0 : i32
    %c0_i32_1 = arith.constant 0 : i32
    return %c0_i32, %c0_i32_0 : i32, i32
  }
  func.func @transform_3(%arg0: i32) -> (i32, i32) {
    %c0_i32 = arith.constant 0 : i32
    %c0_i32_0 = arith.constant 0 : i32
    %c0_i32_1 = arith.constant 0 : i32
    return %c0_i32, %c0_i32_0 : i32, i32
  }
  func.func @transform_4(%arg0: i32) -> (i32, i32) {
    %c0_i32 = arith.constant 0 : i32
    %c0_i32_0 = arith.constant 0 : i32
    %c0_i32_1 = arith.constant 0 : i32
    return %c0_i32, %c0_i32_0 : i32, i32
  }
  func.func @transform_5(%arg0: i32) -> (i32, i32) {
    %c0_i32 = arith.constant 0 : i32
    %c0_i32_0 = arith.constant 0 : i32
    return %arg0, %c0_i32 : i32, i32
  }
}

</mosaic_0001>

<bundles_post_ra>
// kernel: tpu_custom_call.1
= control target key start
LH: loop header
LB: loop body
LE: loop exit
PB: predicated region body
PF: predicated region fallthrough
CT: control target
= control target key end

     0   :  { %v277_v1 = vmov 0.0   ;;  %vm278_vm0 = vmmov 0   ;;  %vm52_vm1 = vcmask 261120   ;;  %s354_s0 = inlined_call_operand.vmem [shape: bf16[16,32], index: 0, kind: input, shape index: {}]   ;;  %s355_s1 = inlined_call_operand.vmem [shape: bf16[32,64], index: 1, kind: input, shape index: {}]   ;;  %s356_s2 = inlined_call_operand.vmem [shape: f32[1,64], index: 2, kind: input, shape index: {}]   ;;  %s357_s3 = inlined_call_operand.vmem [shape: bf16[64,32], index: 3, kind: input, shape index: {}]   ;;  %s358_s4 = inlined_call_operand.vmem [shape: f32[1,32], index: 4, kind: input, shape index: {}]   ;;  %s359_s5 = inlined_call_operand.hbm [shape: f32[16,32], index: 5, kind: output, shape index: {}]  }
   0x1   :  { %v246_v0 = vld [vmem:[%s355_s1] sm:$0xff]   ;;  %221 = vmatprep.subr.bf16.mxu0 %v277_v1  ;;  %229 = vmatprep.subr.bf16.mxu1 %v277_v1  ;;  %v247_v2 = vld [vmem:[%s355_s1 + $0x8] sm:$0xff]  }
   0x2   :  { %222 = vmatpush3.bf16.msra.mxu0 %v246_v0  ;;  %225 = vmatprep.mubr.msk.bf16.mxu0 %vm278_vm0, %v277_v1  ;;  %v249_v3 = vld [vmem:[%s357_s3] sm:$0xff]   ;;  %v250_v5 = vld [vmem:[%s357_s3 + $0x8] sm:$0xff]  }
   0x3   :  { %223 = vmatprep.subr.bf16.mxu0 %v277_v1  ;;  %237 = vmatprep.mubr.msk.bf16.mxu1 %vm278_vm0, %v277_v1  ;;  %v248_v4 = vld [vmem:[%s354_s0] sm:$0xff]  }
   0x4   :  { %230 = vmatpush3.bf16.msra.mxu1 %v249_v3 }
   0x5   :  { %231 = vmatprep.subr.bf16.mxu1 %v277_v1 }
   0x6   :  { %224 = vmatpush3.bf16.msra.mxu0 %v247_v2 }
   0x7   :  { %10 = vsyncpa [#allocation3], 0  ;;  %v251_v6 = vld [vmem:[%s357_s3 + $0x10] sm:$0xff]   ;;  %v252_v7 = vld [vmem:[%s357_s3 + $0x18] sm:$0xff]   ;;  %vm139_vm2 = vcmask 523264   ;;  %s279_s3 = smov [#allocation2]  }
   0x8   :  { %232 = vmatpush3.bf16.msra.mxu1 %v250_v5  ;;  %v202_v8 = vld [vmem:[%s356_s2] ss:$0 sm:$0xff]  ;;  %s191_s9 = sshll.u32 %s279_s3, 4  ;;  %s192_s9 = int_to_ptr.vmem [resolvable:$true] %s191_s9 }
   0x9   :  { %226 = vmatmul.mubr.msk.bf16.vlgmr.msra.gmra.mrb[0].mxu0 %vm52_vm1, %v248_v4  ;;  %233 = vmatprep.subr.bf16.mxu1 %v277_v1  ;;  %v207_v18 = vld [vmem:[%s358_s4] ss:$0 sm:$0xff]  ;;  %s253_s2 = scalar_lea.vmem %s192_s9, 256  ;;  %p258_p1 = scmp.lt.s32.totalorder %s192_s9, %s192_s9 }
   0xa   :  { %p254_p0 = scmp.ne.s32.totalorder %s192_s9, %s253_s2  ;;  %p259_p2 = scmp.lt.s32.totalorder %s253_s2, %s253_s2 }
   0xc   :  { %234 = vmatpush3.bf16.msra.mxu1 %v251_v6  ;;  %p260_p3 = por %p259_p2, %p258_p1 }
   0xd   :  { %235 = vmatprep.subr.bf16.mxu1 %v277_v1 }
   0xe   :  { %p261_p4 = pnand %p260_p3, %p254_p0 }
  0x10   :  { %236 = vmatpush3.bf16.msra.mxu1 %v252_v7 }
  0xdc   :  { %v90_v9 = vpop.f32.mrb[0].mxu0 }
  0xdd   :  { %v91_v10 = vadd.f32 %v202_v8, %v90_v9  ;;  %v227_v11 = vpop.f32.mrb[1].mxu0 }
  0xde   :  { %v93_v12 = vpop.f32.mrb[2].mxu0 }
  0xdf   :  { %v94_v13 = vadd.f32 %v202_v8, %v93_v12  ;;  %v228_v14 = vpop.f32.mrb[3].mxu0  ;;  %v97_v15 = vmax.f32 %v91_v10, 0.0 }
  0xe1   :  { %v98_v16 = vmax.f32 %v94_v13, 0.0 }
  0xe3   :  { %v99_v17 = vpack.c.bf16 %v98_v16, %v97_v15 }
  0xe5   :  { %238 = vmatmul.mubr.msk.bf16.vlgmr.msra.gmra.mrb[0].mxu1 %vm139_vm2, %v99_v17 }
 0x1b8   :  { %v177_v19 = vpop.f32.mrb[0].mxu1 }
 0x1b9   :  { %v178_v20 = vadd.f32 %v207_v18, %v177_v19  ;;  %v239_v21 = vpop.f32.mrb[1].mxu1 }
 0x1ba   :  { %v180_v22 = vpop.f32.mrb[2].mxu1 }
 0x1bb   :  { %184 = vst.msk [vmem:[#allocation2] sm:$0xff] %vm52_vm1, %v178_v20  ;;  %v181_v23 = vadd.f32 %v207_v18, %v180_v22  ;;  %v240_v24 = vpop.f32.mrb[3].mxu1 }
 0x1bd   :  { %185 = vst.msk [vmem:[#allocation2 + $0x8] sm:$0xff] %vm52_vm1, %v181_v23 }
 0x1be   :  { %264 = shalt.err (!%p261_p4)
}
 0x1bf   :  { %s265_s11 = scalar_lea.hbm %s359_s5, 256 }
 0x1c0   :  { %p266_p5 = scmp.ne.s32.totalorder %s359_s5, %s265_s11  ;;  %p269_p6 = scmp.lt.u32.totalorder %s265_s11, %s359_s5 }
 0x1c2   :  { %p271_p7 = pnand %p269_p6, %p266_p5 }
 0x1c4   :  { %274 = shalt.err (!%p271_p7)
}
 0x1c5   :  { %s280_s16 = smov 128   ;;  %s281_s17 = smov 8  }
 0x1c6   :  { %197 = dma.vmem_to_hbm [thread:$0]  %s192_s9, 256, %s359_s5, [#allocation3], %s280_s16, %s280_s16, %s281_s17  }
 0x1c7   :  { %275 = dma.done.wait [#allocation3], 256  }
 0x1c8   :  { %276 = vsyncadd [#allocation3], 4294967040 }
 0x1c9   :  { %201 = vsyncpa [#allocation3], 1 }

</bundles_post_ra>
